<compile_context>
chip_gen: v7x
topology: tpu7x:2x2x1
jax: 0.10.0
libtpu: 0.0.40
codegen_flags: <defaults>
</compile_context>

<pallas_src>
import functools

import numpy as np
import jax
import jax.numpy as jnp
from jax.experimental import pallas as pl
from jax.experimental.pallas import tpu as pltpu

THRESHOLD = 0.0  # decision threshold of the synthetic ASV model


def _batch_tile(B):
    """Pick the batch-tile size.

    Full batch when tiny; otherwise the largest divisor-of-B multiple of 8
    that is <= 1024 and (for B >= 16) <= B//2, so the grid has >= 2 steps and
    both v7x TensorCores get work (no-op on single-TC v5e/v6e).
    """
    if B <= 8:
        return B
    cap = min(1024, B // 2 if B >= 16 else B)
    best = None
    for cand in range(8, cap + 1, 8):
        if B % cand == 0:
            best = cand
    return best if best is not None else B  # full-dim block is always legal


def _vmem_limit_bytes(tb, C, L, D):
    """Explicit VMEM limit only when the real footprint needs it.

    Double-buffered estimate: two (tb, C*L) f32 inputs, W + W^T resident, two
    small outputs.  Below ~14 MiB we keep the default scoped limit (important
    on v7x where physical VMEM is only 64 MiB); above it (possible on v5e's
    16 MiB default with very large tiles) we size the limit to ~2x footprint.
    """
    est = (2 * tb * C * L * 4 * 2      # x2 + xt2, double-buffered
           + 2 * L * D * 4 * 2         # W + W^T
           + (tb * 1 + tb * L) * 4 * 2)  # outputs
    need = 2 * est
    return need if need > 14 * 1024 * 1024 else None


# ----------------------------------------------------------------------------
# Fused kernel: channel mean for test + target utterances, one concatenated
# embedding matmul, similarity score, and analytic (unsigned) input gradient
# w.r.t. the channel-mean signal.
# ----------------------------------------------------------------------------
def eot_fused_kernel(x_ref, xt_ref, w_ref, wt_ref, score_ref, dxm_ref, *, C, L):
    x2 = x_ref[...]                                      # (tb, C*L)
    xt2 = xt_ref[...]                                    # (tb, C*L)

    # channel mean as C static, 128-aligned lane slices (pure VALU adds)
    xm = x2[:, 0:L]
    tm = xt2[:, 0:L]
    for c in range(1, C):
        xm = xm + x2[:, c * L:(c + 1) * L]
        tm = tm + xt2[:, c * L:(c + 1) * L]
    inv_c = jnp.float32(1.0 / C)
    xm = xm * inv_c                                      # (tb, L)
    tm = tm * inv_c                                      # (tb, L)

    # single concatenated matmul: (2*tb, L) @ (L, D) -> doubled MXU M-dim
    both = jnp.concatenate([xm, tm], axis=0)             # (2*tb, L)
    e = jnp.tanh(jnp.dot(both, w_ref[...],
                         preferred_element_type=jnp.float32))  # (2*tb, D)
    tb = xm.shape[0]
    ex = e[:tb]                                           # test embedding
    et = e[tb:]                                           # target embedding

    score_ref[...] = jnp.sum(ex * et, axis=-1, keepdims=True)   # (tb, 1)

    # unsigned gradient w.r.t. the channel-mean xm (W^T is a pre-transposed
    # input, so both matmuls are pure MXU paths — no in-kernel transpose)
    g_embed = (1.0 - ex * ex) * et                       # (tb, D)
    dxm_ref[...] = jnp.dot(g_embed, wt_ref[...],
                           preferred_element_type=jnp.float32)  # (tb, L)


def asv_forward_grad(x, x_tgt, w, wt):
    """One fused pallas_call: scores (B,1) and unsigned dxm (B,L)."""
    B, C, L = x.shape
    D = w.shape[1]
    tb = _batch_tile(B)

    # free reshapes on contiguous arrays: channel axis folded into lanes
    x2 = x.reshape(B, C * L)
    xt2 = x_tgt.reshape(B, C * L)

    compiler_params = pltpu.CompilerParams(
        dimension_semantics=("parallel",),
        vmem_limit_bytes=_vmem_limit_bytes(tb, C, L, D),
    )

    scores, dxm = pl.pallas_call(
        functools.partial(eot_fused_kernel, C=C, L=L),
        grid=(B // tb,),
        in_specs=[
            pl.BlockSpec((tb, C * L), lambda i: (i, 0)),   # x   (flattened)
            pl.BlockSpec((tb, C * L), lambda i: (i, 0)),   # x_tgt (flattened)
            pl.BlockSpec((L, D), lambda i: (0, 0)),        # W    (resident)
            pl.BlockSpec((D, L), lambda i: (0, 0)),        # W^T  (resident)
        ],
        out_specs=(
            pl.BlockSpec((tb, 1), lambda i: (i, 0)),       # score
            pl.BlockSpec((tb, L), lambda i: (i, 0)),       # unsigned dxm
        ),
        out_shape=(
            jax.ShapeDtypeStruct((B, 1), jnp.float32),
            jax.ShapeDtypeStruct((B, L), jnp.float32),
        ),
        compiler_params=compiler_params,
    )(x2, xt2, w, wt)

    return scores, dxm


# ----------------------------------------------------------------------------
# EOT forward: same outputs as the PyTorch control flow.  Because the
# synthetic model is deterministic, every repeat of every EOT batch is
# identical, so mean-over-EOT_batch_size is the identity and the accumulate
# over EOT_num_batches is a scalar multiply — no tiling, one kernel pass.
# ----------------------------------------------------------------------------
def eot_forward(x_batch, x_tgt_batch, y_batch, w,
                EOT_num_batches=1, EOT_batch_size=1, use_grad=True):
    n_audios, n_channels, max_len = x_batch.shape
    wt = jnp.transpose(w)                                 # one-time, outside kernel

    scores1, dxm = asv_forward_grad(
        x_batch.astype(jnp.float32), x_tgt_batch.astype(jnp.float32), w, wt)

    sign = 1.0 - 2.0 * y_batch.astype(jnp.float32)        # (B,)
    nb = jnp.float32(EOT_num_batches)

    scores = nb * scores1                                  # (B, 1) sum over EOT batches
    loss = nb * sign * scores1[:, 0]                       # (B,)

    grad = None
    if use_grad:
        # fold sign * EOT_num_batches * (1/C) into the channel broadcast
        scale = (sign * (nb / n_channels))[:, None, None]  # (B, 1, 1)
        grad = scale * jnp.broadcast_to(
            dxm[:, None, :], (n_audios, n_channels, max_len))

    # decisions stay on-device; threshold at 0 is sign-preserving so scaled vs
    # unscaled scores give identical decisions
    decisions_dev = scores1[:, 0] > THRESHOLD              # (B,) bool, device
    return scores, loss, grad, decisions_dev


def decisions_to_list(decisions_dev, EOT_num_batches, EOT_batch_size):
    """Host-side expansion of decisions to the torch-style nested list.

    Deferred out of the hot path (call after block_until_ready).  Every EOT
    repeat of the deterministic model gives the same decision, so each
    per-audio list is the single decision replicated n_rep times.
    """
    dec_np = np.asarray(decisions_dev).astype(np.int32)
    n_rep = EOT_num_batches * EOT_batch_size
    return [[int(d)] * n_rep for d in dec_np]


if __name__ == "__main__":
    # small, deterministic example shapes (lane-dense: L and D multiples of 128)
    n_audios, n_channels, max_len = 2, 4, 256
    embed_dim = 128
    EOT_size, EOT_batch_size = 4, 2
    EOT_num_batches = EOT_size // EOT_batch_size

    key = jax.random.PRNGKey(0)
    kx, kt, kw = jax.random.split(key, 3)
    x_batch = jax.random.normal(kx, (n_audios, n_channels, max_len), jnp.float32)
    x_tgt_batch = jax.random.normal(kt, (n_audios, n_channels, max_len), jnp.float32)
    y_batch = jnp.array([1, 0], dtype=jnp.int32)
    # deterministic "model weight"
    W = jax.random.normal(kw, (max_len, embed_dim), jnp.float32) * 0.05

    scores, loss, grad, decisions_dev = eot_forward(
        x_batch, x_tgt_batch, y_batch, W,
        EOT_num_batches=EOT_num_batches, EOT_batch_size=EOT_batch_size)

    jax.block_until_ready((scores, loss, grad, decisions_dev))
    decisions = decisions_to_list(decisions_dev, EOT_num_batches, EOT_batch_size)

    assert scores.shape == (n_audios, 1)
    assert loss.shape == (n_audios,)
    assert grad.shape == (n_audios, n_channels, max_len)
    assert len(decisions) == n_audios
    assert all(len(d) == EOT_num_batches * EOT_batch_size for d in decisions)
    assert bool(jnp.all(jnp.isfinite(scores)))
    assert bool(jnp.all(jnp.isfinite(grad)))
    print("KERNEL_OK")
</pallas_src>

<mosaic_0001>
module attributes {stable_mosaic.version = 11 : i64} {
  func.func @eot_fused_kernel(%arg0: i32, %arg1: memref<2x1024xf32, #tpu.memory_space<vmem>>, %arg2: memref<2x1024xf32, #tpu.memory_space<vmem>>, %arg3: memref<256x128xf32, #tpu.memory_space<vmem>>, %arg4: memref<128x256xf32, #tpu.memory_space<vmem>>, %arg5: memref<2x1xf32, #tpu.memory_space<vmem>>, %arg6: memref<2x256xf32, #tpu.memory_space<vmem>>) attributes {dimension_semantics = [#tpu.dimension_semantics<parallel>], iteration_bounds = array<i64: 1>, scalar_prefetch = 0 : i64, scratch_operands = 0 : i64, tpu.core_type = #tpu.core_type<tc>, window_params = [{transform_indices = @transform_0, window_bounds = array<i64: 2, 1024>}, {transform_indices = @transform_1, window_bounds = array<i64: 2, 1024>}, {pipeline_mode = #tpu.pipeline_mode<synchronous>, transform_indices = @transform_2, window_bounds = array<i64: 256, 128>}, {pipeline_mode = #tpu.pipeline_mode<synchronous>, transform_indices = @transform_3, window_bounds = array<i64: 128, 256>}, {transform_indices = @transform_4, window_bounds = array<i64: 2, 1>}, {transform_indices = @transform_5, window_bounds = array<i64: 2, 256>}]} {
    %c0 = arith.constant 0 : index
    %c0_0 = arith.constant 0 : index
    %0 = vector.load %arg1[%c0, %c0_0] : memref<2x1024xf32, #tpu.memory_space<vmem>>, vector<2x1024xf32>
    %c0_1 = arith.constant 0 : index
    %c0_2 = arith.constant 0 : index
    %1 = vector.load %arg2[%c0_1, %c0_2] : memref<2x1024xf32, #tpu.memory_space<vmem>>, vector<2x1024xf32>
    %2 = vector.extract_strided_slice %0 {offsets = [0, 0], sizes = [2, 256], strides = [1, 1]} : vector<2x1024xf32> to vector<2x256xf32>
    %3 = vector.extract_strided_slice %1 {offsets = [0, 0], sizes = [2, 256], strides = [1, 1]} : vector<2x1024xf32> to vector<2x256xf32>
    %4 = vector.extract_strided_slice %0 {offsets = [0, 256], sizes = [2, 256], strides = [1, 1]} : vector<2x1024xf32> to vector<2x256xf32>
    %5 = arith.addf %2, %4 : vector<2x256xf32>
    %6 = vector.extract_strided_slice %1 {offsets = [0, 256], sizes = [2, 256], strides = [1, 1]} : vector<2x1024xf32> to vector<2x256xf32>
    %7 = arith.addf %3, %6 : vector<2x256xf32>
    %8 = vector.extract_strided_slice %0 {offsets = [0, 512], sizes = [2, 256], strides = [1, 1]} : vector<2x1024xf32> to vector<2x256xf32>
    %9 = arith.addf %5, %8 : vector<2x256xf32>
    %10 = vector.extract_strided_slice %1 {offsets = [0, 512], sizes = [2, 256], strides = [1, 1]} : vector<2x1024xf32> to vector<2x256xf32>
    %11 = arith.addf %7, %10 : vector<2x256xf32>
    %12 = vector.extract_strided_slice %0 {offsets = [0, 768], sizes = [2, 256], strides = [1, 1]} : vector<2x1024xf32> to vector<2x256xf32>
    %13 = arith.addf %9, %12 : vector<2x256xf32>
    %14 = vector.extract_strided_slice %1 {offsets = [0, 768], sizes = [2, 256], strides = [1, 1]} : vector<2x1024xf32> to vector<2x256xf32>
    %15 = arith.addf %11, %14 : vector<2x256xf32>
    %cst = arith.constant 2.500000e-01 : f32
    %16 = vector.broadcast %cst : f32 to vector<2x256xf32>
    %17 = arith.mulf %13, %16 : vector<2x256xf32>
    %cst_3 = arith.constant 2.500000e-01 : f32
    %18 = vector.broadcast %cst_3 : f32 to vector<2x256xf32>
    %19 = arith.mulf %15, %18 : vector<2x256xf32>
    %20 = tpu.concatenate %17, %19 in 0 : vector<2x256xf32>, vector<2x256xf32> -> vector<4x256xf32>
    %c0_4 = arith.constant 0 : index
    %c0_5 = arith.constant 0 : index
    %21 = vector.load %arg3[%c0_4, %c0_5] : memref<256x128xf32, #tpu.memory_space<vmem>>, vector<256x128xf32>
    %cst_6 = arith.constant dense<0.000000e+00> : vector<4x128xf32>
    %22 = tpu.matmul %20, %21, %cst_6 {dimension_numbers = #tpu.dot_dimension_numbers<[1], [0], [0], [1], [0, 0, 1, 1], [], []>} : vector<4x256xf32>, vector<256x128xf32>, vector<4x128xf32> -> vector<4x128xf32>
    %23 = math.tanh %22 : vector<4x128xf32>
    %24 = vector.extract_strided_slice %23 {offsets = [0, 0], sizes = [2, 128], strides = [1, 1]} : vector<4x128xf32> to vector<2x128xf32>
    %25 = vector.extract_strided_slice %23 {offsets = [2, 0], sizes = [2, 128], strides = [1, 1]} : vector<4x128xf32> to vector<2x128xf32>
    %26 = arith.mulf %24, %25 : vector<2x128xf32>
    %cst_7 = arith.constant dense<0.000000e+00> : vector<2xf32>
    %27 = vector.multi_reduction <add>, %26, %cst_7 [1] : vector<2x128xf32> to vector<2xf32>
    %28 = vector.shape_cast %27 : vector<2xf32> to vector<2x1xf32>
    %c0_8 = arith.constant 0 : index
    %c0_9 = arith.constant 0 : index
    %29 = vector.load %arg5[%c0_8, %c0_9] : memref<2x1xf32, #tpu.memory_space<vmem>>, vector<2x1xf32>
    tpu.vector_store %arg5[%c0_8, %c0_9], %28 {strides = array<i32>} : memref<2x1xf32, #tpu.memory_space<vmem>>, vector<2x1xf32>,
    %30 = arith.mulf %24, %24 : vector<2x128xf32>
    %cst_10 = arith.constant 1.000000e+00 : f32
    %31 = vector.broadcast %cst_10 : f32 to vector<2x128xf32>
    %32 = arith.subf %31, %30 : vector<2x128xf32>
    %33 = arith.mulf %32, %25 : vector<2x128xf32>
    %c0_11 = arith.constant 0 : index
    %c0_12 = arith.constant 0 : index
    %34 = vector.load %arg4[%c0_11, %c0_12] : memref<128x256xf32, #tpu.memory_space<vmem>>, vector<128x256xf32>
    %cst_13 = arith.constant dense<0.000000e+00> : vector<2x256xf32>
    %35 = tpu.matmul %33, %34, %cst_13 {dimension_numbers = #tpu.dot_dimension_numbers<[1], [0], [0], [1], [0, 0, 1, 1], [], []>} : vector<2x128xf32>, vector<128x256xf32>, vector<2x256xf32> -> vector<2x256xf32>
    %c0_14 = arith.constant 0 : index
    %c0_15 = arith.constant 0 : index
    %36 = vector.load %arg6[%c0_14, %c0_15] : memref<2x256xf32, #tpu.memory_space<vmem>>, vector<2x256xf32>
    tpu.vector_store %arg6[%c0_14, %c0_15], %35 {strides = array<i32>} : memref<2x256xf32, #tpu.memory_space<vmem>>, vector<2x256xf32>,
    return
  }
  func.func @transform_0(%arg0: i32) -> (i32, i32) {
    %c0_i32 = arith.constant 0 : i32
    %c0_i32_0 = arith.constant 0 : i32
    return %arg0, %c0_i32 : i32, i32
  }
  func.func @transform_1(%arg0: i32) -> (i32, i32) {
    %c0_i32 = arith.constant 0 : i32
    %c0_i32_0 = arith.constant 0 : i32
    return %arg0, %c0_i32 : i32, i32
  }
  func.func @transform_2(%arg0: i32) -> (i32, i32) {
    %c0_i32 = arith.constant 0 : i32
    %c0_i32_0 = arith.constant 0 : i32
    %c0_i32_1 = arith.constant 0 : i32
    return %c0_i32, %c0_i32_0 : i32, i32
  }
  func.func @transform_3(%arg0: i32) -> (i32, i32) {
    %c0_i32 = arith.constant 0 : i32
    %c0_i32_0 = arith.constant 0 : i32
    %c0_i32_1 = arith.constant 0 : i32
    return %c0_i32, %c0_i32_0 : i32, i32
  }
  func.func @transform_4(%arg0: i32) -> (i32, i32) {
    %c0_i32 = arith.constant 0 : i32
    %c0_i32_0 = arith.constant 0 : i32
    return %arg0, %c0_i32 : i32, i32
  }
  func.func @transform_5(%arg0: i32) -> (i32, i32) {
    %c0_i32 = arith.constant 0 : i32
    %c0_i32_0 = arith.constant 0 : i32
    return %arg0, %c0_i32 : i32, i32
  }
}

</mosaic_0001>

<bundles_post_ra>
// kernel: tpu_custom_call.1
= control target key start
LH: loop header
LB: loop body
LE: loop exit
PB: predicated region body
PF: predicated region fallthrough
CT: control target
= control target key end

     0   :  { %11 = vsyncpa [#allocation3], 0  ;;  %s710_s0 = inlined_call_operand.hbm [shape: f32[2,1024], index: 0, kind: input, shape index: {}]   ;;  %s711_s1 = inlined_call_operand.hbm [shape: f32[2,1024], index: 1, kind: input, shape index: {}]   ;;  %s712_s2 = inlined_call_operand.hbm [shape: f32[256,128], index: 2, kind: input, shape index: {}]   ;;  %s713_s3 = inlined_call_operand.hbm [shape: f32[128,256], index: 3, kind: input, shape index: {}]   ;;  %s714_s4 = inlined_call_operand.vmem [shape: f32[2,1], index: 4, kind: output, shape index: {0}]   ;;  %s715_s5 = inlined_call_operand.hbm [shape: f32[2,256], index: 5, kind: output, shape index: {1}]  }
   0x1   :  { %12 = vsyncpa [#allocation6], 0 }
   0x2   :  { %13 = vsyncpa [#allocation9], 0 }
   0x3   :  { %14 = vsyncpa [#allocation4], 0  ;;  %s603_s18 = smov [#allocation5]   ;;  %s604_s20 = smov [#allocation2]  }
   0x4   :  { %s31_s19 = sshll.u32 %s603_s18, 4  ;;  %s21_s21 = sshll.u32 %s604_s20, 4  ;;  %s32_s19 = int_to_ptr.vmem [resolvable:$true] %s31_s19  ;;  %s22_s21 = int_to_ptr.vmem [resolvable:$true] %s21_s21 }
   0x5   :  { %s485_s24 = scalar_lea.hbm %s711_s1, 256 }
   0x6   :  { %p486_p0 = scmp.ne.s32.totalorder %s711_s1, %s485_s24  ;;  %p489_p1 = scmp.lt.u32.totalorder %s485_s24, %s711_s1 }
   0x8   :  { %p491_p2 = pnand %p489_p1, %p486_p0 }
   0xa   :  { %494 = shalt.err (!%p491_p2)
}
   0xb   :  { %s495_s29 = scalar_lea.vmem %s32_s19, 256  ;;  %p500_p4 = scmp.lt.s32.totalorder %s32_s19, %s32_s19 }
   0xc   :  { %p496_p3 = scmp.ne.s32.totalorder %s32_s19, %s495_s29  ;;  %p501_p5 = scmp.lt.s32.totalorder %s495_s29, %s495_s29 }
   0xe   :  { %p502_p6 = por %p501_p5, %p500_p4 }
  0x10   :  { %p503_p7 = pnand %p502_p6, %p496_p3 }
  0x12   :  { %506 = shalt.err (!%p503_p7)
}
  0x13   :  { %34 = dma.hbm_to_vmem [thread:$0]  %s711_s1, 256, %s32_s19, [#allocation6]  }
  0x14   :  { %s507_s9 = scalar_lea.hbm %s710_s0, 256 }
  0x15   :  { %p508_p8 = scmp.ne.s32.totalorder %s710_s0, %s507_s9  ;;  %p511_p9 = scmp.lt.u32.totalorder %s507_s9, %s710_s0 }
  0x17   :  { %p513_p10 = pnand %p511_p9, %p508_p8 }
  0x19   :  { %516 = shalt.err (!%p513_p10)
}
  0x1a   :  { %s517_s14 = scalar_lea.vmem %s22_s21, 256  ;;  %p522_p12 = scmp.lt.s32.totalorder %s22_s21, %s22_s21 }
  0x1b   :  { %p518_p11 = scmp.ne.s32.totalorder %s22_s21, %s517_s14  ;;  %p523_p13 = scmp.lt.s32.totalorder %s517_s14, %s517_s14 }
  0x1d   :  { %p524_p0 = por %p523_p13, %p522_p12 }
  0x1f   :  { %p525_p1 = pnand %p524_p0, %p518_p11 }
  0x21   :  { %528 = shalt.err (!%p525_p1)
}
  0x22   :  { %24 = dma.hbm_to_vmem [thread:$0]  %s710_s0, 256, %s22_s21, [#allocation3]  }
  0x23   :  { %s605_s16 = smov [#allocation7]   ;;  %s529_s20 = scalar_lea.hbm %s712_s2, 4096 }
  0x24   :  { %s40_s17 = sshll.u32 %s605_s16, 4  ;;  %p530_p2 = scmp.ne.s32.totalorder %s712_s2, %s529_s20  ;;  %s41_s17 = int_to_ptr.vmem [resolvable:$true] %s40_s17 }
  0x25   :  { %p533_p3 = scmp.lt.u32.totalorder %s529_s20, %s712_s2 }
  0x27   :  { %p535_p4 = pnand %p533_p3, %p530_p2 }
  0x29   :  { %538 = shalt.err (!%p535_p4)
}
  0x2a   :  { %s539_s26 = scalar_lea.vmem %s41_s17, 4096  ;;  %p544_p6 = scmp.lt.s32.totalorder %s41_s17, %s41_s17 }
  0x2b   :  { %p540_p5 = scmp.ne.s32.totalorder %s41_s17, %s539_s26  ;;  %p545_p7 = scmp.lt.s32.totalorder %s539_s26, %s539_s26 }
  0x2d   :  { %p546_p8 = por %p545_p7, %p544_p6 }
  0x2f   :  { %p547_p9 = pnand %p546_p8, %p540_p5 }
  0x31   :  { %550 = shalt.err (!%p547_p9)
}
  0x32   :  { %s606_s0 = smov 128   ;;  %s607_s21 = smov 8  }
  0x33   :  { %46 = dma.hbm_to_vmem [thread:$0]  %s712_s2, 4096, %s41_s17, [#allocation6], %s606_s0, %s606_s0, %s607_s21  }
  0x34   :  { %s608_s29 = smov [#allocation8]   ;;  %s551_s8 = scalar_lea.hbm %s713_s3, 4096 }
  0x35   :  { %s52_s30 = sshll.u32 %s608_s29, 4  ;;  %p552_p10 = scmp.ne.s32.totalorder %s713_s3, %s551_s8  ;;  %s53_s30 = int_to_ptr.vmem [resolvable:$true] %s52_s30 }
  0x36   :  { %p555_p11 = scmp.lt.u32.totalorder %s551_s8, %s713_s3 }
  0x38   :  { %p557_p12 = pnand %p555_p11, %p552_p10 }
  0x3a   :  { %560 = shalt.err (!%p557_p12)
}
  0x3b   :  { %s561_s13 = scalar_lea.vmem %s53_s30, 4096  ;;  %p566_p0 = scmp.lt.s32.totalorder %s53_s30, %s53_s30 }
  0x3c   :  { %p562_p13 = scmp.ne.s32.totalorder %s53_s30, %s561_s13  ;;  %p567_p1 = scmp.lt.s32.totalorder %s561_s13, %s561_s13 }
  0x3e   :  { %p568_p2 = por %p567_p1, %p566_p0 }
  0x40   :  { %p569_p3 = pnand %p568_p2, %p562_p13 }
  0x42   :  { %572 = shalt.err (!%p569_p3)
}
  0x43   :  { %s609_s2 = smov 256   ;;  %s610_s14 = smov 16  }
  0x44   :  { %58 = dma.hbm_to_vmem [thread:$0]  %s713_s3, 4096, %s53_s30, [#allocation9], %s609_s2, %s609_s2, %s610_s14  }
  0x45   :  { %595 = dma.done.wait [#allocation3], 256  }
  0x46   :  { %596 = vsyncadd [#allocation3], 4294967040 }
  0x47   :  { %597 = dma.done.wait [#allocation6], 4352  }
  0x48   :  { %598 = vsyncadd [#allocation6], 4294962944 }
  0x49   :  { %599 = dma.done.wait [#allocation9], 4096  }
  0x4a   :  { %600 = vsyncadd [#allocation9], 4294963200  ;;  %v137_v0 = vld [vmem:[#allocation7 + $0x80] sm:$0xff]  ;;  %v138_v1 = vld [vmem:[#allocation7 + $0x88] sm:$0xff]  ;;  %v611_v19 = vmov 1983009808   ;;  %v99_v21 = vlaneseq }
  0x4b   :  { %v121_v2 = vld [vmem:[#allocation7] sm:$0xff]  ;;  %v408_v3 = vpack.c.bf16 %v138_v1, %v137_v0  ;;  %v122_v4 = vld [vmem:[#allocation7 + $0x8] sm:$0xff]  ;;  %v139_v5 = vld [vmem:[#allocation7 + $0x90] sm:$0xff]  ;;  %v97_v20 = vunpack.c.l.s4 %v611_v19  ;;  %vm118_vm0 = vcmask 1041408   ;;  %vm231_vm1 = vcmask 1024   ;;  %s613_s17 = smov [#allocation10]  }
  0x4c   :  { %v140_v6 = vld [vmem:[#allocation7 + $0x98] sm:$0xff]  ;;  %v410_v7 = vpack.c.bf16 %v122_v4, %v121_v2  ;;  %v123_v9 = vld [vmem:[#allocation7 + $0x10] sm:$0xff]  ;;  %v141_v11 = vld [vmem:[#allocation7 + $0xa0] sm:$0xff]  ;;  %v100_v36 = vshrl.u32 %v99_v21, 7  ;;  %s359_s18 = sshll.u32 %s613_s17, 4  ;;  %s360_s18 = int_to_ptr.vmem [resolvable:$true] %s359_s18 }
  0x4d   :  { %v412_v8 = vpack.c.bf16 %v140_v6, %v139_v5  ;;  %v124_v10 = vld [vmem:[#allocation7 + $0x18] sm:$0xff]  ;;  %409 = vmatprep.subr.bf16.mxu0 %v408_v3  ;;  %v142_v12 = vld [vmem:[#allocation7 + $0xa8] sm:$0xff]  ;;  %v125_v15 = vld [vmem:[#allocation7 + $0x20] sm:$0xff]  ;;  %v98_v35 = vunpack.c.0.s8 %v97_v20  ;;  %s573_s19 = scalar_lea.vmem %s360_s18, 64  ;;  %p578_p5 = scmp.lt.s32.totalorder %s360_s18, %s360_s18 }
  0x4e   :  { %411 = vmatpush3.bf16.msra.mxu0 %v410_v7  ;;  %v414_v13 = vpack.c.bf16 %v124_v10, %v123_v9  ;;  %v416_v14 = vpack.c.bf16 %v142_v12, %v141_v11  ;;  %v126_v16 = vld [vmem:[#allocation7 + $0x28] sm:$0xff]  ;;  %v143_v17 = vld [vmem:[#allocation7 + $0xb0] sm:$0xff]  ;;  %v144_v18 = vld [vmem:[#allocation7 + $0xb8] sm:$0xff]  ;;  %p574_p4 = scmp.ne.s32.totalorder %s360_s18, %s573_s19  ;;  %p579_p6 = scmp.lt.s32.totalorder %s573_s19, %s573_s19 }
  0x4f   :  { %413 = vmatprep.subr.bf16.mxu0 %v412_v8  ;;  %v418_v22 = vpack.c.bf16 %v126_v16, %v125_v15  ;;  %v420_v23 = vpack.c.bf16 %v144_v18, %v143_v17  ;;  %v127_v24 = vld [vmem:[#allocation7 + $0x30] sm:$0xff]  ;;  %v128_v25 = vld [vmem:[#allocation7 + $0x38] sm:$0xff]  ;;  %v145_v26 = vld [vmem:[#allocation7 + $0xc0] sm:$0xff]  ;;  %v101_v59 = vsub.s32 %v98_v35, %v100_v36 }
  0x50   :  { %v146_v27 = vld [vmem:[#allocation7 + $0xc8] sm:$0xff]  ;;  %v71_v28 = vld [vmem:[#allocation2] sm:$0xff]  ;;  %v73_v32 = vld [vmem:[#allocation5] sm:$0xff]  ;;  %v422_v37 = vpack.c.bf16 %v128_v25, %v127_v24  ;;  %p580_p7 = por %p579_p6, %p578_p5 }
  0x51   :  { %v129_v29 = vld [vmem:[#allocation7 + $0x40] sm:$0xff]  ;;  %v130_v30 = vld [vmem:[#allocation7 + $0x48] sm:$0xff]  ;;  %v74_v33 = vld [vmem:[#allocation5 + $0x8] sm:$0xff]  ;;  %v76_v34 = vrot.slane %v71_v28, 4  ;;  %v80_v40 = vrot.slane %v73_v32, 4  ;;  %v424_v44 = vpack.c.bf16 %v146_v27, %v145_v26 }
  0x52   :  { %415 = vmatpush3.bf16.msra.mxu0 %v414_v13  ;;  %v72_v31 = vld [vmem:[#allocation2 + $0x8] sm:$0xff]  ;;  %v147_v38 = vld [vmem:[#allocation7 + $0xd0] sm:$0xff]  ;;  %v148_v39 = vld [vmem:[#allocation7 + $0xd8] sm:$0xff]  ;;  %v90_v52 = vrot.slane %v74_v33, 4  ;;  %v426_v61 = vpack.c.bf16 %v130_v30, %v129_v29  ;;  %p581_p8 = pnand %p580_p7, %p574_p4 }
  0x53   :  { %417 = vmatprep.subr.bf16.mxu0 %v416_v14  ;;  %v237_v41 = vld [vmem:[#allocation8 + $0x8] sm:$0xff]  ;;  %v239_v42 = vld [vmem:[#allocation8 + $0x18] sm:$0xff]  ;;  %v236_v43 = vld [vmem:[#allocation8] sm:$0xff]  ;;  %v78_v45 = vadd.f32 %v76_v34, %v71_v28  ;;  %v86_v46 = vrot.slane %v72_v31, 4  ;;  %v82_v51 = vadd.f32 %v80_v40, %v73_v32  ;;  %v428_v1 = vpack.c.bf16 %v148_v39, %v147_v38 }
  0x54   :  { %v440_v47 = vpack.c.bf16 %v239_v42, %v237_v41  ;;  %v238_v48 = vld [vmem:[#allocation8 + $0x10] sm:$0xff]  ;;  %v241_v49 = vld [vmem:[#allocation8 + $0x28] sm:$0xff]  ;;  %v243_v50 = vld [vmem:[#allocation8 + $0x38] sm:$0xff] }
  0x55   :  { %v442_v53 = vpack.c.bf16 %v238_v48, %v236_v43  ;;  %v444_v54 = vpack.c.bf16 %v243_v50, %v241_v49  ;;  %v240_v55 = vld [vmem:[#allocation8 + $0x20] sm:$0xff]  ;;  %v242_v56 = vld [vmem:[#allocation8 + $0x30] sm:$0xff]  ;;  %v245_v57 = vld [vmem:[#allocation8 + $0x48] sm:$0xff]  ;;  %v83_v58 = vadd.f32 %v78_v45, %v72_v31  ;;  %v84_v63 = vadd.f32 %v82_v51, %v74_v33 }
  0x56   :  { %419 = vmatpush3.bf16.msra.mxu0 %v418_v22  ;;  %441 = vmatprep.subr.bf16.mxu1 %v440_v47  ;;  %v247_v60 = vld [vmem:[#allocation8 + $0x58] sm:$0xff]  ;;  %v131_v62 = vld [vmem:[#allocation7 + $0x50] sm:$0xff]  ;;  %v446_v0 = vpack.c.bf16 %v242_v56, %v240_v55  ;;  %v244_v5 = vld [vmem:[#allocation8 + $0x40] sm:$0xff] }
  0x57   :  { %421 = vmatprep.subr.bf16.mxu0 %v420_v23  ;;  %443 = vmatpush1.bf16.msra.mxu1 %v442_v53  ;;  %v132_v2 = vld [vmem:[#allocation7 + $0x58] sm:$0xff]  ;;  %v88_v3 = vadd.f32 %v86_v46, %v83_v58  ;;  %v448_v4 = vpack.c.bf16 %v247_v60, %v245_v57  ;;  %v246_v6 = vld [vmem:[#allocation8 + $0x50] sm:$0xff]  ;;  %v149_v7 = vld [vmem:[#allocation7 + $0xe0] sm:$0xff]  ;;  %v92_v9 = vadd.f32 %v90_v52, %v84_v63 }
  0x58   :  { %445 = vmatprep.subr.bf16.mxu1 %v444_v54  ;;  %v150_v8 = vld [vmem:[#allocation7 + $0xe8] sm:$0xff]  ;;  %v430_v11 = vpack.c.bf16 %v132_v2, %v131_v62  ;;  %v450_v13 = vpack.c.bf16 %v246_v6, %v244_v5  ;;  %v133_v15 = vld [vmem:[#allocation7 + $0x60] sm:$0xff]  ;;  %v151_v18 = vld [vmem:[#allocation7 + $0xf0] sm:$0xff] }
  0x59   :  { %v93_v10 = vmul.f32 0.25, %v88_v3  ;;  %v94_v12 = vmul.f32 0.25, %v92_v9  ;;  %v432_v14 = vpack.c.bf16 %v150_v8, %v149_v7  ;;  %v134_v16 = vld [vmem:[#allocation7 + $0x68] sm:$0xff]  ;;  %v152_v19 = vld [vmem:[#allocation7 + $0xf8] sm:$0xff]  ;;  %v135_v25 = vld [vmem:[#allocation7 + $0x70] sm:$0xff] }
  0x5a   :  { %423 = vmatpush3.bf16.msra.mxu0 %v422_v37  ;;  %v434_v21 = vpack.c.bf16 %v134_v16, %v133_v15  ;;  %v436_v24 = vpack.c.bf16 %v152_v19, %v151_v18  ;;  %v136_v26 = vld [vmem:[#allocation7 + $0x78] sm:$0xff]  ;;  %v249_v31 = vld [vmem:[#allocation8 + $0x68] sm:$0xff]  ;;  %v248_v34 = vld [vmem:[#allocation8 + $0x60] sm:$0xff] }
  0x5b   :  { %425 = vmatprep.subr.bf16.mxu0 %v424_v44  ;;  %447 = vmatpush1.bf16.msra.mxu1 %v446_v0  ;;  %v102_v17 = vrot.slane %v93_v10, %v101_v59  ;;  %v107_v20 = vcombine.low %v94_v12, %v94_v12  ;;  %v438_v28 = vpack.c.bf16 %v136_v26, %v135_v25  ;;  %v251_v32 = vld [vmem:[#allocation8 + $0x78] sm:$0xff]  ;;  %v250_v35 = vld [vmem:[#allocation8 + $0x70] sm:$0xff]  ;;  %v253_v37 = vld [vmem:[#allocation8 + $0x88] sm:$0xff] }
  0x5c   :  { %449 = vmatprep.subr.bf16.mxu1 %v448_v4  ;;  %v452_v33 = vpack.c.bf16 %v251_v32, %v249_v31  ;;  %v454_v36 = vpack.c.bf16 %v250_v35, %v248_v34  ;;  %v255_v38 = vld [vmem:[#allocation8 + $0x98] sm:$0xff]  ;;  %v252_v40 = vld [vmem:[#allocation8 + $0x80] sm:$0xff]  ;;  %v254_v41 = vld [vmem:[#allocation8 + $0x90] sm:$0xff] }
  0x5d   :  { %v103_v22 = vcombine.high %v102_v17, %v102_v17  ;;  %v114_v23 = vrot.slane %v107_v20, %v101_v59  ;;  %v456_v39 = vpack.c.bf16 %v255_v38, %v253_v37  ;;  %v458_v42 = vpack.c.bf16 %v254_v41, %v252_v40  ;;  %v257_v43 = vld [vmem:[#allocation8 + $0xa8] sm:$0xff]  ;;  %v259_v44 = vld [vmem:[#allocation8 + $0xb8] sm:$0xff]  ;;  %v256_v45 = vld [vmem:[#allocation8 + $0xa0] sm:$0xff] }
  0x5e   :  { %427 = vmatpush3.bf16.msra.mxu0 %v426_v61  ;;  %v460_v46 = vpack.c.bf16 %v259_v44, %v257_v43  ;;  %v258_v47 = vld [vmem:[#allocation8 + $0xb0] sm:$0xff]  ;;  %v261_v48 = vld [vmem:[#allocation8 + $0xc8] sm:$0xff]  ;;  %v263_v49 = vld [vmem:[#allocation8 + $0xd8] sm:$0xff]  ;;  %v612_v61 = vmov 0.0  }
  0x5f   :  { %429 = vmatprep.subr.bf16.mxu0 %v428_v1  ;;  %451 = vmatpush1.bf16.msra.mxu1 %v450_v13  ;;  %v115_v27 = vcombine.high %v114_v23, %v114_v23  ;;  %v119_v30 = vsel %vm118_vm0, %v102_v17, %v114_v23  ;;  %v462_v50 = vpack.c.bf16 %v258_v47, %v256_v45  ;;  %v260_v52 = vld [vmem:[#allocation8 + $0xc0] sm:$0xff]  ;;  %v262_v53 = vld [vmem:[#allocation8 + $0xd0] sm:$0xff]  ;;  %v265_v54 = vld [vmem:[#allocation8 + $0xe8] sm:$0xff] }
  0x60   :  { %453 = vmatprep.subr.bf16.mxu1 %v452_v33  ;;  %v464_v51 = vpack.c.bf16 %v263_v49, %v261_v48  ;;  %v267_v55 = vld [vmem:[#allocation8 + $0xf8] sm:$0xff]  ;;  %v466_v56 = vpack.c.bf16 %v262_v53, %v260_v52  ;;  %v264_v58 = vld [vmem:[#allocation8 + $0xe0] sm:$0xff]  ;;  %v266_v59 = vld [vmem:[#allocation8 + $0xf0] sm:$0xff]  ;;  %332 = vmatprep.mubr.f32.mxu1 %v612_v61 }
  0x61   :  { %v120_v29 = vsel %vm118_vm0, %v103_v22, %v115_v27  ;;  %v468_v57 = vpack.c.bf16 %v267_v55, %v265_v54  ;;  %v470_v60 = vpack.c.bf16 %v266_v59, %v264_v58 }
  0x62   :  { %431 = vmatpush3.bf16.msra.mxu0 %v430_v11  ;;  %217 = vmatprep.mubr.f32.mxu0 %v120_v29 }
  0x63   :  { %433 = vmatprep.subr.bf16.mxu0 %v432_v14  ;;  %455 = vmatpush1.bf16.msra.mxu1 %v454_v36 }
  0x64   :  { %457 = vmatprep.subr.bf16.mxu1 %v456_v39 }
  0x66   :  { %435 = vmatpush3.bf16.msra.mxu0 %v434_v21 }
  0x67   :  { %437 = vmatprep.subr.bf16.mxu0 %v436_v24  ;;  %459 = vmatpush1.bf16.msra.mxu1 %v458_v42 }
  0x68   :  { %461 = vmatprep.subr.bf16.mxu1 %v460_v46 }
  0x6a   :  { %439 = vmatpush3.bf16.msra.mxu0 %v438_v28 }
  0x6b   :  { %463 = vmatpush1.bf16.msra.mxu1 %v462_v50 }
  0x6c   :  { %465 = vmatprep.subr.bf16.mxu1 %v464_v51 }
  0x6d   :  { %218 = vmatmul.mubr.f32.vlgmr.msra.gmra.mrb[0].mxu0 %v119_v30 }
  0x6f   :  { %467 = vmatpush1.bf16.msra.mxu1 %v466_v56 }
  0x70   :  { %469 = vmatprep.subr.bf16.mxu1 %v468_v57 }
  0x73   :  { %471 = vmatpush1.bf16.msra.mxu1 %v470_v60 }
 0x140   :  { %v405_v62 = vpop.f32.mrb[0].mxu0 }
 0x141   :  { %v406_v63 = vpop.f32.mrb[1].mxu0 }
 0x142   :  { %v407_v0 = vadd.f32 %v406_v63, %v405_v62 }
 0x144   :  { %483 = vtanh.f32 %v407_v0 }
 0x14e   :  { %v484_v1 = vpop.eup %483 }
 0x14f   :  { %v225_v2 = vrot.slane %v484_v1, 2  ;;  %v233_v3 = vmul.f32 %v484_v1, %v484_v1 }
 0x151   :  { %v227_v4 = vmul.f32 %v484_v1, %v225_v2  ;;  %v234_v5 = vsub.f32 1.0, %v233_v3 }
 0x153   :  { %v228_v6 = vsel %vm118_vm0, %v227_v4, 0.0  ;;  %v235_v7 = vmul.f32 %v234_v5, %v225_v2 }
 0x154   :  { %229 = vadd.xlane.f32.xlu0 %v228_v6 }
 0x155   :  { %333 = vmatmul.mubr.f32.vlgmr.msra.gmra.mrb[0].mxu1 %v235_v7 }
 0x1e1   :  { %v230_v8 = vpop.xlane.xlu0 %229 }
 0x1e2   :  { %232 = vst.msk [vmem:[%s714_s4] sm:$0x3] %vm231_vm1, %v230_v8 }
 0x228   :  { %v334_v9 = vpop.f32.mrb[0].mxu1 }
 0x229   :  { %v336_v10 = vpop.f32.mrb[1].mxu1 }
 0x22a   :  { %v341_v11 = vcombine.low %v334_v9, %v336_v10 }
 0x22c   :  { %372 = vst.sshfl [vmem:[#allocation10] sm:$0x33 pattern:$0x76325410] %v341_v11 }
 0x22d   :  { %584 = shalt.err (!%p581_p8)
}
 0x22e   :  { %s585_s23 = scalar_lea.hbm %s715_s5, 64 }
 0x22f   :  { %p586_p9 = scmp.ne.s32.totalorder %s715_s5, %s585_s23  ;;  %p589_p10 = scmp.lt.u32.totalorder %s585_s23, %s715_s5 }
 0x231   :  { %p591_p11 = pnand %p589_p10, %p586_p9 }
 0x233   :  { %594 = shalt.err (!%p591_p11)
}
 0x234   :  { %362 = dma.vmem_to_hbm [thread:$0]  %s360_s18, 64, %s715_s5, [#allocation4]  }
 0x235   :  { %601 = dma.done.wait [#allocation4], 64  }
 0x236   :  { %602 = vsyncadd [#allocation4], 4294967232 }
 0x237   :  { %368 = vsyncpa [#allocation3], 1 }
 0x238   :  { %369 = vsyncpa [#allocation6], 1 }
 0x239   :  { %370 = vsyncpa [#allocation9], 1 }
 0x23a   :  { %371 = vsyncpa [#allocation4], 1 }

</bundles_post_ra>
